<compile_context>
chip_gen: v6e
topology: v6e:2x2x1
jax: 0.10.0
libtpu: 0.0.40
codegen_flags: <defaults>
</compile_context>

<pallas_src>
import functools

import jax
import jax.numpy as jnp
from jax.experimental import pallas as pl
from jax.experimental.pallas import tpu as pltpu


# --------------------------------- kernels -----------------------------------

def _pool_hw_value_slice_kernel(x_ref, o_ref, *, w2):
    """Full 2x2/stride-2 max pool.

    x_ref: (Tb, 2*w2) rows laid out as [even H row | odd H row].
    o_ref: (Tb, w2 // 2).
    W-pair max via stride-2 slices of the H-pooled value (lane de-interleave).
    """
    h = jnp.maximum(x_ref[:, :w2], x_ref[:, w2:])        # H-pair max   (Tb, w2)
    o_ref[...] = jnp.maximum(h[:, 0::2], h[:, 1::2])     # W-pair max   (Tb, w2//2)


def _pool_hw_ref_stride_kernel(x_ref, o_ref, *, w2):
    """Full 2x2 max pool using four stride-2 ref loads instead of value slices."""
    wp = w2 // 2
    p00 = x_ref[:, pl.ds(0, wp, stride=2)]       # even H row, even cols
    p01 = x_ref[:, pl.ds(1, wp, stride=2)]       # even H row, odd  cols
    p10 = x_ref[:, pl.ds(w2, wp, stride=2)]      # odd  H row, even cols
    p11 = x_ref[:, pl.ds(w2 + 1, wp, stride=2)]  # odd  H row, odd  cols
    o_ref[...] = jnp.maximum(jnp.maximum(p00, p01), jnp.maximum(p10, p11))


def _pool_h_only_kernel(x_ref, o_ref, *, w2):
    """H-pair max only (safe everywhere); the W-pair max is fused by XLA."""
    o_ref[...] = jnp.maximum(x_ref[:, :w2], x_ref[:, w2:])


# ------------------------------ pallas_call glue ------------------------------

def _pick_block_rows(m, row_bytes, *, target_bytes=1 << 20, min_steps=8):
    """Rows per block: ~1 MiB input blocks, >= min_steps grid steps when the
    problem allows, and a multiple of 8 rows so every block satisfies the
    (8, 128) tiling rule on its last two dims."""
    if m <= 8:
        return m                                   # block == full dim
    tb = max(1, target_bytes // max(row_bytes, 1))
    tb = min(tb, max(1, pl.cdiv(m, min_steps)))    # expose enough grid steps
    tb = max(8, 8 * (tb // 8))                     # sublane-granule rows
    return min(tb, 8 * pl.cdiv(m, 8))


def _pooled_rows_call(kernel, x_rows, out_cols):
    """Run `kernel` over independent row blocks: (M, Win) -> (M, out_cols)."""
    m, w_in = x_rows.shape
    itemsize = x_rows.dtype.itemsize
    tb = _pick_block_rows(m, w_in * itemsize)
    grid = (pl.cdiv(m, tb),)

    in_block = tb * w_in * itemsize
    out_block = tb * out_cols * itemsize
    # 2x (double buffer) for in + out blocks, plus slack for compiler temps.
    vmem_limit = int(min(48 << 20, max(16 << 20, 4 * (in_block + out_block))))

    return pl.pallas_call(
        kernel,
        out_shape=jax.ShapeDtypeStruct((m, out_cols), x_rows.dtype),
        grid_spec=pltpu.PrefetchScalarGridSpec(
            num_scalar_prefetch=0,
            grid=grid,
            in_specs=[pl.BlockSpec((tb, w_in), lambda i: (i, 0))],
            out_specs=pl.BlockSpec((tb, out_cols), lambda i: (i, 0)),
        ),
        compiler_params=pltpu.CompilerParams(
            dimension_semantics=("parallel",),
            vmem_limit_bytes=vmem_limit,
        ),
    )(x_rows)


# ------------------------------- forward pass --------------------------------

def _forward_impl(x_nchw, mode):
    n, c, h, w = x_nchw.shape
    hp, wp = h // 2, w // 2
    w2 = 2 * wp
    # Floor-mode pooling drops a trailing odd row / column (no-op when even).
    x = x_nchw[:, :, : 2 * hp, : w2]
    # FREE row-major reshape (no transpose, no copy): one view row per output
    # row, laid out as [even H row | odd H row].
    x_rows = x.reshape(n * c * hp, 2 * w2)

    if mode == "fused_value":
        out = _pooled_rows_call(
            functools.partial(_pool_hw_value_slice_kernel, w2=w2), x_rows, wp)
    elif mode == "fused_ref":
        out = _pooled_rows_call(
            functools.partial(_pool_hw_ref_stride_kernel, w2=w2), x_rows, wp)
    else:  # "hybrid": H-pair max in Pallas, W-pair max as one fused XLA op.
        h_rows = _pooled_rows_call(
            functools.partial(_pool_h_only_kernel, w2=w2), x_rows, w2)
        out = jnp.maximum(h_rows[:, 0::2], h_rows[:, 1::2])

    return out.reshape(n, c, hp, wp)


_forward_jit = jax.jit(_forward_impl, static_argnums=(1,))


def _reference_pool(x):
    n, c, h, w = x.shape
    x = x[:, :, : 2 * (h // 2), : 2 * (w // 2)]
    return jnp.maximum(
        jnp.maximum(x[:, :, 0::2, 0::2], x[:, :, 0::2, 1::2]),
        jnp.maximum(x[:, :, 1::2, 0::2], x[:, :, 1::2, 1::2]),
    )


_MODE = None


def _select_mode():
    """Pick the fastest kernel variant that compiles AND matches the reference
    on this Mosaic version; otherwise use the always-safe hybrid path."""
    global _MODE
    if _MODE is not None:
        return _MODE
    probe = jnp.sin(jnp.arange(1 * 3 * 6 * 20, dtype=jnp.float32)).reshape(1, 3, 6, 20)
    want = _reference_pool(probe)
    for mode in ("fused_value", "fused_ref"):
        try:
            got = _forward_impl(probe, mode)   # eager: compiles + runs here
            if got.shape == want.shape and bool(jnp.array_equal(got, want)):
                _MODE = mode
                return _MODE
        except Exception:
            pass
    _MODE = "hybrid"
    return _MODE


def down_sample_forward(x_nchw):
    """nn.MaxPool2d(kernel_size=2, stride=2) forward on an NCHW tensor."""
    return _forward_jit(x_nchw, _select_mode())


# ----------------------------------- main -------------------------------------

if __name__ == "__main__":
    key = jax.random.PRNGKey(0)
    x = jax.random.normal(key, (2, 4, 16, 16), jnp.float32)   # (N, C, H, W)

    out = down_sample_forward(x)
    out = jax.block_until_ready(out)

    ref = _reference_pool(x)
    assert out.shape == (2, 4, 8, 8), out.shape
    assert out.dtype == x.dtype
    assert bool(jnp.array_equal(out, ref)), "Pallas maxpool mismatch vs reference"
    print("KERNEL_OK")
</pallas_src>

<mosaic_0001>
module attributes {stable_mosaic.version = 11 : i64} {
  func.func @_pool_hw_ref_stride_kernel(%arg0: i32, %arg1: memref<8x40xf32, #tpu.memory_space<vmem>>, %arg2: memref<8x10xf32, #tpu.memory_space<vmem>>) attributes {dimension_semantics = [#tpu.dimension_semantics<parallel>], iteration_bounds = array<i64: 2>, scalar_prefetch = 0 : i64, scratch_operands = 0 : i64, tpu.core_type = #tpu.core_type<tc>, window_params = [{transform_indices = @transform_0, window_bounds = array<i64: 8, 40>}, {transform_indices = @transform_1, window_bounds = array<i64: 8, 10>}]} {
    %c0 = arith.constant 0 : index
    %c0_0 = arith.constant 0 : index
    %0 = tpu.strided_load %arg1[%c0, %c0_0] {strides = array<i32: 1, 2>} : memref<8x40xf32, #tpu.memory_space<vmem>>, vector<8x10xf32>
    %c0_1 = arith.constant 0 : index
    %c1 = arith.constant 1 : index
    %1 = tpu.strided_load %arg1[%c0_1, %c1] {strides = array<i32: 1, 2>} : memref<8x40xf32, #tpu.memory_space<vmem>>, vector<8x10xf32>
    %c0_2 = arith.constant 0 : index
    %c20 = arith.constant 20 : index
    %2 = tpu.strided_load %arg1[%c0_2, %c20] {strides = array<i32: 1, 2>} : memref<8x40xf32, #tpu.memory_space<vmem>>, vector<8x10xf32>
    %c0_3 = arith.constant 0 : index
    %c21 = arith.constant 21 : index
    %3 = tpu.strided_load %arg1[%c0_3, %c21] {strides = array<i32: 1, 2>} : memref<8x40xf32, #tpu.memory_space<vmem>>, vector<8x10xf32>
    %4 = arith.maximumf %0, %1 : vector<8x10xf32>
    %5 = arith.maximumf %2, %3 : vector<8x10xf32>
    %6 = arith.maximumf %4, %5 : vector<8x10xf32>
    %c0_4 = arith.constant 0 : index
    %c0_5 = arith.constant 0 : index
    %7 = vector.load %arg2[%c0_4, %c0_5] : memref<8x10xf32, #tpu.memory_space<vmem>>, vector<8x10xf32>
    tpu.vector_store %arg2[%c0_4, %c0_5], %6 {strides = array<i32>} : memref<8x10xf32, #tpu.memory_space<vmem>>, vector<8x10xf32>,
    return
  }
  func.func @transform_0(%arg0: i32) -> (i32, i32) {
    %c0_i32 = arith.constant 0 : i32
    %c0_i32_0 = arith.constant 0 : i32
    return %arg0, %c0_i32 : i32, i32
  }
  func.func @transform_1(%arg0: i32) -> (i32, i32) {
    %c0_i32 = arith.constant 0 : i32
    %c0_i32_0 = arith.constant 0 : i32
    return %arg0, %c0_i32 : i32, i32
  }
}

module attributes {stable_mosaic.version = 11 : i64} {
  func.func @_pool_h_only_kernel(%arg0: i32, %arg1: memref<8x32xf32, #tpu.memory_space<vmem>>, %arg2: memref<8x16xf32, #tpu.memory_space<vmem>>) attributes {dimension_semantics = [#tpu.dimension_semantics<parallel>], iteration_bounds = array<i64: 8>, scalar_prefetch = 0 : i64, scratch_operands = 0 : i64, tpu.core_type = #tpu.core_type<tc>, window_params = [{transform_indices = @transform_0, window_bounds = array<i64: 8, 32>}, {transform_indices = @transform_1, window_bounds = array<i64: 8, 16>}]} {
    %c0 = arith.constant 0 : index
    %c0_0 = arith.constant 0 : index
    %0 = vector.load %arg1[%c0, %c0_0] : memref<8x32xf32, #tpu.memory_space<vmem>>, vector<8x16xf32>
    %c0_1 = arith.constant 0 : index
    %c16 = arith.constant 16 : index
    %1 = vector.load %arg1[%c0_1, %c16] : memref<8x32xf32, #tpu.memory_space<vmem>>, vector<8x16xf32>
    %2 = arith.maximumf %0, %1 : vector<8x16xf32>
    %c0_2 = arith.constant 0 : index
    %c0_3 = arith.constant 0 : index
    %3 = vector.load %arg2[%c0_2, %c0_3] : memref<8x16xf32, #tpu.memory_space<vmem>>, vector<8x16xf32>
    tpu.vector_store %arg2[%c0_2, %c0_3], %2 {strides = array<i32>} : memref<8x16xf32, #tpu.memory_space<vmem>>, vector<8x16xf32>,
    return
  }
  func.func @transform_0(%arg0: i32) -> (i32, i32) {
    %c0_i32 = arith.constant 0 : i32
    %c0_i32_0 = arith.constant 0 : i32
    return %arg0, %c0_i32 : i32, i32
  }
  func.func @transform_1(%arg0: i32) -> (i32, i32) {
    %c0_i32 = arith.constant 0 : i32
    %c0_i32_0 = arith.constant 0 : i32
    return %arg0, %c0_i32 : i32, i32
  }
}

</mosaic_0001>

<bundles_post_ra>
// kernel: _forward_impl.1
= control target key start
LH: loop header
LB: loop body
LE: loop exit
PB: predicated region body
PF: predicated region fallthrough
CT: control target
= control target key end

     0   :  { %s195_s6 = smov 0   ;;  %s216_s0 = inlined_call_operand.vmem [shape: f32[64,32], index: 0, kind: input, shape index: {}]   ;;  %s217_s1 = inlined_call_operand.vmem [shape: f32[64,16], index: 1, kind: output, shape index: {}]  }
   0x1 LB: > { %s173_s7 = sadd.s32 4294967295, %s197_s6   ;;  %p177_p0 = scmp.ge.s32.totalorder %s197_s6, 1  ;;  %s197_s6 = sphi %s195_s6, %s11_s6  }
   0x2   : > { %p86_p1 = scmp.lt.s32.totalorder %s197_s6, 9 }
   0x4   : > { %p87_p2 = pnand %p177_p0, %p86_p1 }
   0x5   : > { %p104_p3 = scmp.lt.s32.totalorder (!%p87_p2), %s173_s7, 7  ;;  %s199_s12 = smov (!%p87_p2), 112  }
   0x6   : > { %90 = sbr.rel (%p87_p2) target bundleno = 133 (0x85), region = 24 }
   0xb   : > { %s219_s7 = smov (!%p104_p3, %s173_s7), 7  ;;  %vm118_vm0 = vcmask 130048  }
   0xc   : > { %s178_s8 = sshll.u32 %s219_s7, 3 }
   0xd   : > { %s107_s11 = scalar_lea.vmem %s216_s0, %s178_s8  ;;  %s111_s15 = scalar_lea.vmem %s217_s1, %s178_s8 }
   0xe   : > { %v112_v0 = vld [vmem:[%s107_s11] sm:$0xff] }
   0xf   : > { %114 = vrot.lane.b32.xlu0 %v112_v0, %s199_s12 }
  0x81   : > { %v115_v1 = vpop.permute.xlu0 %114 }
  0x82   : > { %v117_v2 = vmax.f32 %v112_v0, %v115_v1 }
  0x84   : > { %119 = vst.msk [vmem:[%s111_s15] sm:$0xff] %vm118_vm0, %v117_v2 }
  0x85 PF: > { %s11_s6 = sadd.s32 1, %s197_s6  }
  0x86   : > { %p8_p4 = scmp.ge.s32.totalorder %s11_s6, 10  }
  0x88   :  { %10 = sbr.rel (!%p8_p4) target bundleno = 1 (0x1), region = 54 }

</bundles_post_ra>
